<compile_context>
chip_gen: v5e
topology: v5e:2x2
jax: 0.10.0
libtpu: 0.0.40
codegen_flags: <defaults>
</compile_context>

<pallas_src>
import functools

import jax
import jax.numpy as jnp
from jax import lax
from jax.experimental import pallas as pl
from jax.experimental.pallas import tpu as pltpu

# ----- model dims (small, consistent with a T5 block) -----
B = 2        # batch
S = 8        # sequence length
D = 32       # d_model
H = 4        # num heads
DK = 8       # d_kv per head  (inner_dim = H * DK = 32)
DFF = 64     # d_ff
EPS = 1e-6   # T5LayerNorm eps


def t5_block_kernel(x_ref, ln1_ref, wqkv_ref, wo_ref, ln2_ref, wi_ref, wof_ref,
                    out_ref, *, n_batch, seq, n_heads, d_kv):
    """Single invocation; whole (B*S, D) problem resident in VMEM."""
    x = x_ref[...]                                    # (B*S, D) f32
    inner = n_heads * d_kv

    # ---- T5LayerNorm #1 (RMS norm: no mean subtraction, no bias) ----
    var = jnp.mean(x * x, axis=-1, keepdims=True)
    xn = x * lax.rsqrt(var + EPS) * ln1_ref[...]      # (B*S, D)

    # ---- fused Q|K|V projection: one MXU push (B*S, D) @ (D, 3*inner) ----
    qkv = jnp.dot(xn, wqkv_ref[...], preferred_element_type=jnp.float32)
    qkv3 = qkv.reshape(n_batch, seq, 3 * inner)       # sublane-aligned split (B, S, 3*inner)

    # ---- self-attention: batch is the dot batch dim, heads are static lane slices ----
    # T5 does NOT scale scores by 1/sqrt(d_kv); rel-pos bias is zero
    # (has_relative_attention_bias=False, no mask); dropout omitted (eval).
    ctx_heads = []
    for h in range(n_heads):                          # H=4, tiny trace-time unroll
        lo = h * d_kv
        qh = qkv3[:, :, lo:lo + d_kv]                             # (B, S, DK)
        kh = qkv3[:, :, inner + lo:inner + lo + d_kv]             # (B, S, DK)
        vh = qkv3[:, :, 2 * inner + lo:2 * inner + lo + d_kv]     # (B, S, DK)
        s = jnp.einsum('bqd,bkd->bqk', qh, kh,
                       preferred_element_type=jnp.float32)        # (B, S, S)
        s = s - jnp.max(s, axis=-1, keepdims=True)
        e = jnp.exp(s)
        p = e / jnp.sum(e, axis=-1, keepdims=True)                # exact softmax
        ctx_heads.append(jnp.einsum('bqk,bkd->bqd', p, vh,
                                    preferred_element_type=jnp.float32))

    # concat heads along lanes, fold head-sum into a single Wo contraction
    ctx = jnp.concatenate(ctx_heads, axis=-1)          # (B, S, inner)
    ctx2 = ctx.reshape(n_batch * seq, inner)           # (B*S, inner)
    attn = jnp.dot(ctx2, wo_ref[...], preferred_element_type=jnp.float32)

    h1 = x + attn                                      # residual

    # ---- T5LayerFF (DenseReluDense) ----
    var2 = jnp.mean(h1 * h1, axis=-1, keepdims=True)
    hn = h1 * lax.rsqrt(var2 + EPS) * ln2_ref[...]
    ff = jnp.maximum(jnp.dot(hn, wi_ref[...], preferred_element_type=jnp.float32), 0.0)
    ff = jnp.dot(ff, wof_ref[...], preferred_element_type=jnp.float32)

    out_ref[...] = (h1 + ff).astype(out_ref.dtype)


def t5_block_forward(x, params):
    """x: (B, S, D) float32 -> (B, S, D) float32 (T5 encoder block hidden states)."""
    b, s, d = x.shape
    ln1, wq, wk, wv, wo, ln2, wi, wof = params
    inner = wq.shape[1]
    n_heads = H
    d_kv = inner // n_heads

    # Wrapper-side layout plumbing: fused lane-major QKV slab, batch folded into sublanes.
    wqkv = jnp.concatenate([wq, wk, wv], axis=1)       # (D, 3*inner) = (32, 96)
    x2 = x.reshape(b * s, d)                           # (B*S, D) = (16, 32)

    kernel = functools.partial(t5_block_kernel, n_batch=b, seq=s,
                               n_heads=n_heads, d_kv=d_kv)
    vmem = lambda: pl.BlockSpec(memory_space=pltpu.MemorySpace.VMEM)

    out2 = pl.pallas_call(
        kernel,
        out_shape=jax.ShapeDtypeStruct((b * s, d), x.dtype),
        in_specs=[vmem() for _ in range(7)],           # x, ln1, Wqkv, Wo, ln2, Wi, Wo_ff
        out_specs=vmem(),
    )(x2, ln1, wqkv, wo, ln2, wi, wof)
    return out2.reshape(b, s, d)


def init_params(key):
    """Deterministic parameter init matching CustomT5Block shapes (encoder, no rel-bias)."""
    ks = jax.random.split(key, 6)
    scale = 0.02
    inner = H * DK
    ln1 = jnp.ones((1, D), jnp.float32)                           # T5LayerNorm weight
    wq = scale * jax.random.normal(ks[0], (D, inner), jnp.float32)
    wk = scale * jax.random.normal(ks[1], (D, inner), jnp.float32)
    wv = scale * jax.random.normal(ks[2], (D, inner), jnp.float32)
    wo = scale * jax.random.normal(ks[3], (inner, D), jnp.float32)
    ln2 = jnp.ones((1, D), jnp.float32)
    wi = scale * jax.random.normal(ks[4], (D, DFF), jnp.float32)
    wof = scale * jax.random.normal(ks[5], (DFF, D), jnp.float32)
    return (ln1, wq, wk, wv, wo, ln2, wi, wof)


if __name__ == "__main__":
    key = jax.random.PRNGKey(0)
    kx, kp = jax.random.split(key)
    x = jax.random.normal(kx, (B, S, D), jnp.float32)
    params = init_params(kp)

    out = t5_block_forward(x, params)
    jax.block_until_ready(out)
    assert out.shape == (B, S, D) and out.dtype == jnp.float32

    # TODO(synk): checkpoint()/flatten/None->empty-tensor handling is autograd-only
    # bookkeeping (no forward-value effect) and is not representable as a kernel.
    print("KERNEL_OK")
</pallas_src>

<mosaic_0001>
module attributes {stable_mosaic.version = 11 : i64} {
  func.func @t5_block_kernel(%arg0: memref<16x32xf32, #tpu.memory_space<vmem>>, %arg1: memref<1x32xf32, #tpu.memory_space<vmem>>, %arg2: memref<32x96xf32, #tpu.memory_space<vmem>>, %arg3: memref<32x32xf32, #tpu.memory_space<vmem>>, %arg4: memref<1x32xf32, #tpu.memory_space<vmem>>, %arg5: memref<32x64xf32, #tpu.memory_space<vmem>>, %arg6: memref<64x32xf32, #tpu.memory_space<vmem>>, %arg7: memref<16x32xf32, #tpu.memory_space<vmem>>) attributes {dimension_semantics = [], scalar_prefetch = 0 : i64, scratch_operands = 0 : i64, tpu.core_type = #tpu.core_type<tc>} {
    %c0 = arith.constant 0 : index
    %c0_0 = arith.constant 0 : index
    %0 = vector.load %arg0[%c0, %c0_0] : memref<16x32xf32, #tpu.memory_space<vmem>>, vector<16x32xf32>
    %1 = arith.mulf %0, %0 : vector<16x32xf32>
    %cst = arith.constant dense<0.000000e+00> : vector<16xf32>
    %2 = vector.multi_reduction <add>, %1, %cst [1] : vector<16x32xf32> to vector<16xf32>
    %3 = vector.shape_cast %2 : vector<16xf32> to vector<16x1xf32>
    %cst_1 = arith.constant 3.200000e+01 : f32
    %4 = vector.broadcast %cst_1 : f32 to vector<16x1xf32>
    %5 = arith.divf %3, %4 : vector<16x1xf32>
    %cst_2 = arith.constant 9.99999997E-7 : f32
    %6 = vector.broadcast %cst_2 : f32 to vector<16x1xf32>
    %7 = arith.addf %5, %6 : vector<16x1xf32>
    %8 = math.rsqrt %7 : vector<16x1xf32>
    %9 = vector.broadcast %8 : vector<16x1xf32> to vector<16x32xf32>
    %10 = arith.mulf %0, %9 : vector<16x32xf32>
    %c0_3 = arith.constant 0 : index
    %c0_4 = arith.constant 0 : index
    %11 = vector.load %arg1[%c0_3, %c0_4] : memref<1x32xf32, #tpu.memory_space<vmem>>, vector<1x32xf32>
    %12 = vector.broadcast %11 : vector<1x32xf32> to vector<16x32xf32>
    %13 = arith.mulf %10, %12 : vector<16x32xf32>
    %c0_5 = arith.constant 0 : index
    %c0_6 = arith.constant 0 : index
    %14 = vector.load %arg2[%c0_5, %c0_6] : memref<32x96xf32, #tpu.memory_space<vmem>>, vector<32x96xf32>
    %cst_7 = arith.constant dense<0.000000e+00> : vector<16x96xf32>
    %15 = tpu.matmul %13, %14, %cst_7 {dimension_numbers = #tpu.dot_dimension_numbers<[1], [0], [0], [1], [0, 0, 1, 1], [], []>} : vector<16x32xf32>, vector<32x96xf32>, vector<16x96xf32> -> vector<16x96xf32>
    %16 = vector.shape_cast %15 : vector<16x96xf32> to vector<2x8x96xf32>
    %17 = vector.extract_strided_slice %16 {offsets = [0, 0, 0], sizes = [2, 8, 8], strides = [1, 1, 1]} : vector<2x8x96xf32> to vector<2x8x8xf32>
    %18 = vector.extract_strided_slice %16 {offsets = [0, 0, 32], sizes = [2, 8, 8], strides = [1, 1, 1]} : vector<2x8x96xf32> to vector<2x8x8xf32>
    %19 = vector.extract_strided_slice %16 {offsets = [0, 0, 64], sizes = [2, 8, 8], strides = [1, 1, 1]} : vector<2x8x96xf32> to vector<2x8x8xf32>
    "tpu.trace_start"() <{level = 10 : i32, message = "bqd,bkd->bqk"}> : () -> ()
    %cst_8 = arith.constant dense<0.000000e+00> : vector<2x8x8xf32>
    %20 = tpu.matmul %17, %18, %cst_8 {dimension_numbers = #tpu.dot_dimension_numbers<[2], [2], [1], [1], [0, 0, 0, 1, 1, 1], [0], [0]>} : vector<2x8x8xf32>, vector<2x8x8xf32>, vector<2x8x8xf32> -> vector<2x8x8xf32>
    "tpu.trace_stop"() : () -> ()
    %cst_9 = arith.constant dense<0xFF800000> : vector<2x8xf32>
    %21 = vector.multi_reduction <maximumf>, %20, %cst_9 [2] : vector<2x8x8xf32> to vector<2x8xf32>
    %22 = vector.shape_cast %21 : vector<2x8xf32> to vector<2x8x1xf32>
    %23 = vector.broadcast %22 : vector<2x8x1xf32> to vector<2x8x8xf32>
    %24 = arith.subf %20, %23 : vector<2x8x8xf32>
    %25 = math.exp %24 : vector<2x8x8xf32>
    %cst_10 = arith.constant dense<0.000000e+00> : vector<2x8xf32>
    %26 = vector.multi_reduction <add>, %25, %cst_10 [2] : vector<2x8x8xf32> to vector<2x8xf32>
    %27 = vector.shape_cast %26 : vector<2x8xf32> to vector<2x8x1xf32>
    %28 = vector.broadcast %27 : vector<2x8x1xf32> to vector<2x8x8xf32>
    %29 = arith.divf %25, %28 : vector<2x8x8xf32>
    "tpu.trace_start"() <{level = 10 : i32, message = "bqk,bkd->bqd"}> : () -> ()
    %cst_11 = arith.constant dense<0.000000e+00> : vector<2x8x8xf32>
    %30 = tpu.matmul %29, %19, %cst_11 {dimension_numbers = #tpu.dot_dimension_numbers<[2], [1], [1], [2], [0, 0, 0, 1, 1, 2], [0], [0]>} : vector<2x8x8xf32>, vector<2x8x8xf32>, vector<2x8x8xf32> -> vector<2x8x8xf32>
    "tpu.trace_stop"() : () -> ()
    %31 = vector.extract_strided_slice %16 {offsets = [0, 0, 8], sizes = [2, 8, 8], strides = [1, 1, 1]} : vector<2x8x96xf32> to vector<2x8x8xf32>
    %32 = vector.extract_strided_slice %16 {offsets = [0, 0, 40], sizes = [2, 8, 8], strides = [1, 1, 1]} : vector<2x8x96xf32> to vector<2x8x8xf32>
    %33 = vector.extract_strided_slice %16 {offsets = [0, 0, 72], sizes = [2, 8, 8], strides = [1, 1, 1]} : vector<2x8x96xf32> to vector<2x8x8xf32>
    "tpu.trace_start"() <{level = 10 : i32, message = "bqd,bkd->bqk"}> : () -> ()
    %cst_12 = arith.constant dense<0.000000e+00> : vector<2x8x8xf32>
    %34 = tpu.matmul %31, %32, %cst_12 {dimension_numbers = #tpu.dot_dimension_numbers<[2], [2], [1], [1], [0, 0, 0, 1, 1, 1], [0], [0]>} : vector<2x8x8xf32>, vector<2x8x8xf32>, vector<2x8x8xf32> -> vector<2x8x8xf32>
    "tpu.trace_stop"() : () -> ()
    %cst_13 = arith.constant dense<0xFF800000> : vector<2x8xf32>
    %35 = vector.multi_reduction <maximumf>, %34, %cst_13 [2] : vector<2x8x8xf32> to vector<2x8xf32>
    %36 = vector.shape_cast %35 : vector<2x8xf32> to vector<2x8x1xf32>
    %37 = vector.broadcast %36 : vector<2x8x1xf32> to vector<2x8x8xf32>
    %38 = arith.subf %34, %37 : vector<2x8x8xf32>
    %39 = math.exp %38 : vector<2x8x8xf32>
    %cst_14 = arith.constant dense<0.000000e+00> : vector<2x8xf32>
    %40 = vector.multi_reduction <add>, %39, %cst_14 [2] : vector<2x8x8xf32> to vector<2x8xf32>
    %41 = vector.shape_cast %40 : vector<2x8xf32> to vector<2x8x1xf32>
    %42 = vector.broadcast %41 : vector<2x8x1xf32> to vector<2x8x8xf32>
    %43 = arith.divf %39, %42 : vector<2x8x8xf32>
    "tpu.trace_start"() <{level = 10 : i32, message = "bqk,bkd->bqd"}> : () -> ()
    %cst_15 = arith.constant dense<0.000000e+00> : vector<2x8x8xf32>
    %44 = tpu.matmul %43, %33, %cst_15 {dimension_numbers = #tpu.dot_dimension_numbers<[2], [1], [1], [2], [0, 0, 0, 1, 1, 2], [0], [0]>} : vector<2x8x8xf32>, vector<2x8x8xf32>, vector<2x8x8xf32> -> vector<2x8x8xf32>
    "tpu.trace_stop"() : () -> ()
    %45 = vector.extract_strided_slice %16 {offsets = [0, 0, 16], sizes = [2, 8, 8], strides = [1, 1, 1]} : vector<2x8x96xf32> to vector<2x8x8xf32>
    %46 = vector.extract_strided_slice %16 {offsets = [0, 0, 48], sizes = [2, 8, 8], strides = [1, 1, 1]} : vector<2x8x96xf32> to vector<2x8x8xf32>
    %47 = vector.extract_strided_slice %16 {offsets = [0, 0, 80], sizes = [2, 8, 8], strides = [1, 1, 1]} : vector<2x8x96xf32> to vector<2x8x8xf32>
    "tpu.trace_start"() <{level = 10 : i32, message = "bqd,bkd->bqk"}> : () -> ()
    %cst_16 = arith.constant dense<0.000000e+00> : vector<2x8x8xf32>
    %48 = tpu.matmul %45, %46, %cst_16 {dimension_numbers = #tpu.dot_dimension_numbers<[2], [2], [1], [1], [0, 0, 0, 1, 1, 1], [0], [0]>} : vector<2x8x8xf32>, vector<2x8x8xf32>, vector<2x8x8xf32> -> vector<2x8x8xf32>
    "tpu.trace_stop"() : () -> ()
    %cst_17 = arith.constant dense<0xFF800000> : vector<2x8xf32>
    %49 = vector.multi_reduction <maximumf>, %48, %cst_17 [2] : vector<2x8x8xf32> to vector<2x8xf32>
    %50 = vector.shape_cast %49 : vector<2x8xf32> to vector<2x8x1xf32>
    %51 = vector.broadcast %50 : vector<2x8x1xf32> to vector<2x8x8xf32>
    %52 = arith.subf %48, %51 : vector<2x8x8xf32>
    %53 = math.exp %52 : vector<2x8x8xf32>
    %cst_18 = arith.constant dense<0.000000e+00> : vector<2x8xf32>
    %54 = vector.multi_reduction <add>, %53, %cst_18 [2] : vector<2x8x8xf32> to vector<2x8xf32>
    %55 = vector.shape_cast %54 : vector<2x8xf32> to vector<2x8x1xf32>
    %56 = vector.broadcast %55 : vector<2x8x1xf32> to vector<2x8x8xf32>
    %57 = arith.divf %53, %56 : vector<2x8x8xf32>
    "tpu.trace_start"() <{level = 10 : i32, message = "bqk,bkd->bqd"}> : () -> ()
    %cst_19 = arith.constant dense<0.000000e+00> : vector<2x8x8xf32>
    %58 = tpu.matmul %57, %47, %cst_19 {dimension_numbers = #tpu.dot_dimension_numbers<[2], [1], [1], [2], [0, 0, 0, 1, 1, 2], [0], [0]>} : vector<2x8x8xf32>, vector<2x8x8xf32>, vector<2x8x8xf32> -> vector<2x8x8xf32>
    "tpu.trace_stop"() : () -> ()
    %59 = vector.extract_strided_slice %16 {offsets = [0, 0, 24], sizes = [2, 8, 8], strides = [1, 1, 1]} : vector<2x8x96xf32> to vector<2x8x8xf32>
    %60 = vector.extract_strided_slice %16 {offsets = [0, 0, 56], sizes = [2, 8, 8], strides = [1, 1, 1]} : vector<2x8x96xf32> to vector<2x8x8xf32>
    %61 = vector.extract_strided_slice %16 {offsets = [0, 0, 88], sizes = [2, 8, 8], strides = [1, 1, 1]} : vector<2x8x96xf32> to vector<2x8x8xf32>
    "tpu.trace_start"() <{level = 10 : i32, message = "bqd,bkd->bqk"}> : () -> ()
    %cst_20 = arith.constant dense<0.000000e+00> : vector<2x8x8xf32>
    %62 = tpu.matmul %59, %60, %cst_20 {dimension_numbers = #tpu.dot_dimension_numbers<[2], [2], [1], [1], [0, 0, 0, 1, 1, 1], [0], [0]>} : vector<2x8x8xf32>, vector<2x8x8xf32>, vector<2x8x8xf32> -> vector<2x8x8xf32>
    "tpu.trace_stop"() : () -> ()
    %cst_21 = arith.constant dense<0xFF800000> : vector<2x8xf32>
    %63 = vector.multi_reduction <maximumf>, %62, %cst_21 [2] : vector<2x8x8xf32> to vector<2x8xf32>
    %64 = vector.shape_cast %63 : vector<2x8xf32> to vector<2x8x1xf32>
    %65 = vector.broadcast %64 : vector<2x8x1xf32> to vector<2x8x8xf32>
    %66 = arith.subf %62, %65 : vector<2x8x8xf32>
    %67 = math.exp %66 : vector<2x8x8xf32>
    %cst_22 = arith.constant dense<0.000000e+00> : vector<2x8xf32>
    %68 = vector.multi_reduction <add>, %67, %cst_22 [2] : vector<2x8x8xf32> to vector<2x8xf32>
    %69 = vector.shape_cast %68 : vector<2x8xf32> to vector<2x8x1xf32>
    %70 = vector.broadcast %69 : vector<2x8x1xf32> to vector<2x8x8xf32>
    %71 = arith.divf %67, %70 : vector<2x8x8xf32>
    "tpu.trace_start"() <{level = 10 : i32, message = "bqk,bkd->bqd"}> : () -> ()
    %cst_23 = arith.constant dense<0.000000e+00> : vector<2x8x8xf32>
    %72 = tpu.matmul %71, %61, %cst_23 {dimension_numbers = #tpu.dot_dimension_numbers<[2], [1], [1], [2], [0, 0, 0, 1, 1, 2], [0], [0]>} : vector<2x8x8xf32>, vector<2x8x8xf32>, vector<2x8x8xf32> -> vector<2x8x8xf32>
    "tpu.trace_stop"() : () -> ()
    %73 = tpu.concatenate %30, %44, %58, %72 in 2 : vector<2x8x8xf32>, vector<2x8x8xf32>, vector<2x8x8xf32>, vector<2x8x8xf32> -> vector<2x8x32xf32>
    %74 = vector.shape_cast %73 : vector<2x8x32xf32> to vector<16x32xf32>
    %c0_24 = arith.constant 0 : index
    %c0_25 = arith.constant 0 : index
    %75 = vector.load %arg3[%c0_24, %c0_25] : memref<32x32xf32, #tpu.memory_space<vmem>>, vector<32x32xf32>
    %cst_26 = arith.constant dense<0.000000e+00> : vector<16x32xf32>
    %76 = tpu.matmul %74, %75, %cst_26 {dimension_numbers = #tpu.dot_dimension_numbers<[1], [0], [0], [1], [0, 0, 1, 1], [], []>} : vector<16x32xf32>, vector<32x32xf32>, vector<16x32xf32> -> vector<16x32xf32>
    %77 = arith.addf %0, %76 : vector<16x32xf32>
    %78 = arith.mulf %77, %77 : vector<16x32xf32>
    %cst_27 = arith.constant dense<0.000000e+00> : vector<16xf32>
    %79 = vector.multi_reduction <add>, %78, %cst_27 [1] : vector<16x32xf32> to vector<16xf32>
    %80 = vector.shape_cast %79 : vector<16xf32> to vector<16x1xf32>
    %cst_28 = arith.constant 3.200000e+01 : f32
    %81 = vector.broadcast %cst_28 : f32 to vector<16x1xf32>
    %82 = arith.divf %80, %81 : vector<16x1xf32>
    %cst_29 = arith.constant 9.99999997E-7 : f32
    %83 = vector.broadcast %cst_29 : f32 to vector<16x1xf32>
    %84 = arith.addf %82, %83 : vector<16x1xf32>
    %85 = math.rsqrt %84 : vector<16x1xf32>
    %86 = vector.broadcast %85 : vector<16x1xf32> to vector<16x32xf32>
    %87 = arith.mulf %77, %86 : vector<16x32xf32>
    %c0_30 = arith.constant 0 : index
    %c0_31 = arith.constant 0 : index
    %88 = vector.load %arg4[%c0_30, %c0_31] : memref<1x32xf32, #tpu.memory_space<vmem>>, vector<1x32xf32>
    %89 = vector.broadcast %88 : vector<1x32xf32> to vector<16x32xf32>
    %90 = arith.mulf %87, %89 : vector<16x32xf32>
    %c0_32 = arith.constant 0 : index
    %c0_33 = arith.constant 0 : index
    %91 = vector.load %arg5[%c0_32, %c0_33] : memref<32x64xf32, #tpu.memory_space<vmem>>, vector<32x64xf32>
    %cst_34 = arith.constant dense<0.000000e+00> : vector<16x64xf32>
    %92 = tpu.matmul %90, %91, %cst_34 {dimension_numbers = #tpu.dot_dimension_numbers<[1], [0], [0], [1], [0, 0, 1, 1], [], []>} : vector<16x32xf32>, vector<32x64xf32>, vector<16x64xf32> -> vector<16x64xf32>
    %cst_35 = arith.constant 0.000000e+00 : f32
    %93 = vector.broadcast %cst_35 : f32 to vector<16x64xf32>
    %94 = arith.maximumf %92, %93 : vector<16x64xf32>
    %c0_36 = arith.constant 0 : index
    %c0_37 = arith.constant 0 : index
    %95 = vector.load %arg6[%c0_36, %c0_37] : memref<64x32xf32, #tpu.memory_space<vmem>>, vector<64x32xf32>
    %cst_38 = arith.constant dense<0.000000e+00> : vector<16x32xf32>
    %96 = tpu.matmul %94, %95, %cst_38 {dimension_numbers = #tpu.dot_dimension_numbers<[1], [0], [0], [1], [0, 0, 1, 1], [], []>} : vector<16x64xf32>, vector<64x32xf32>, vector<16x32xf32> -> vector<16x32xf32>
    %97 = arith.addf %77, %96 : vector<16x32xf32>
    %c0_39 = arith.constant 0 : index
    %c0_40 = arith.constant 0 : index
    %98 = vector.load %arg7[%c0_39, %c0_40] : memref<16x32xf32, #tpu.memory_space<vmem>>, vector<16x32xf32>
    tpu.vector_store %arg7[%c0_39, %c0_40], %97 {strides = array<i32>} : memref<16x32xf32, #tpu.memory_space<vmem>>, vector<16x32xf32>,
    return
  }
}

</mosaic_0001>

<bundles_post_ra>
// kernel: tpu_custom_call.1
= control target key start
LH: loop header
LB: loop body
LE: loop exit
PB: predicated region body
PF: predicated region fallthrough
CT: control target
= control target key end

     0   :  { %12 = vsyncpa [#allocation3], 0  ;;  %s1459_s0 = inlined_call_operand.hbm [shape: f32[16,32], index: 0, kind: input, shape index: {}]   ;;  %s1460_s1 = inlined_call_operand.hbm [shape: f32[1,32], index: 1, kind: input, shape index: {}]   ;;  %s1461_s2 = inlined_call_operand.vmem [shape: f32[32,96], index: 2, kind: input, shape index: {}]   ;;  %s1462_s3 = inlined_call_operand.vmem [shape: f32[32,32], index: 3, kind: input, shape index: {}]   ;;  %s1463_s4 = inlined_call_operand.vmem [shape: f32[1,32], index: 4, kind: input, shape index: {}]   ;;  %s1464_s5 = inlined_call_operand.vmem [shape: f32[32,64], index: 5, kind: input, shape index: {}]   ;;  %s1465_s6 = inlined_call_operand.vmem [shape: f32[64,32], index: 6, kind: input, shape index: {}]   ;;  %s1466_s7 = inlined_call_operand.hbm [shape: f32[16,32], index: 7, kind: output, shape index: {}]  }
   0x1   :  { %13 = vsyncpa [#allocation6], 0 }
   0x2   :  { %14 = vsyncpa [#allocation4], 0  ;;  %s19_s26 = sshll.u32 %s1459_s0, 4  ;;  %s1140_s27 = smov [#allocation2]   ;;  %s20_s26 = int_to_ptr.hbm [resolvable:$true] %s19_s26 }
   0x3   :  { %s21_s28 = sshll.u32 %s1140_s27, 4  ;;  %s33_s8 = sshll.u32 %s1460_s1, 4  ;;  %s22_s28 = int_to_ptr.vmem [resolvable:$true] %s21_s28  ;;  %s34_s8 = int_to_ptr.hbm [resolvable:$true] %s33_s8 }
   0x4   :  { %s1141_s9 = smov 128   ;;  %s1142_s10 = smov 8  }
   0x5   :  { %27 = dma.hbm_to_vmem [thread:$0]  %s20_s26, 256, %s22_s28, [#allocation3], %s1141_s9, %s1141_s9, %s1142_s10  }
   0x6   :  { %s1143_s11 = smov [#allocation5]  }
   0x7   :  { %s35_s12 = sshll.u32 %s1143_s11, 4  ;;  %s36_s12 = int_to_ptr.vmem [resolvable:$true] %s35_s12 }
   0x8   :  { %38 = dma.hbm_to_vmem [thread:$0]  %s34_s8, 16, %s36_s12, [#allocation6]  }
   0x9   :  { %1134 = dma.done.wait [#allocation3], 256  }
   0xa   :  { %1135 = vsyncadd [#allocation3], 4294967040 }
   0xb   :  { %1136 = dma.done.wait [#allocation6], 16  }
   0xc   :  { %1137 = vsyncadd [#allocation6], 4294967280  ;;  %v1208_v0 = vld [vmem:[#allocation2] sm:$0xff]  ;;  %vm61_vm0 = vcmask 261120   ;;  %v1210_v1 = vld [vmem:[#allocation2 + $0x8] sm:$0xff]  ;;  %v1144_v6 = vmov 32.0  }
   0xd   :  { %v59_v2 = vmul.f32 %v1208_v0, %v1208_v0  ;;  %v60_v3 = vmul.f32 %v1210_v1, %v1210_v1  ;;  %1020 = vrcp.f32 %v1144_v6  ;;  %v110_v10 = vld [vmem:[%s1461_s2 + $0x18] sm:$0xff]  ;;  %v109_v11 = vld [vmem:[%s1461_s2 + $0x10] sm:$0xff]  ;;  %v108_v12 = vld [vmem:[%s1461_s2 + $0x8] sm:$0xff]  ;;  %s1146_s19 = smov 88   ;;  %s1147_s20 = smov 120   ;;  %vm143_vm8 = vcmask 64512  }
   0xe   :  { %129 = vmatpush.msra.mxu0 %v110_v10  ;;  %v107_v14 = vld [vmem:[%s1461_s2] sm:$0xff]  ;;  %v1018_v35 = vld [vmem:[#allocation5] ss:$0 sm:$0xff]  ;;  %s1145_s2 = smov 96   ;;  %s1148_s21 = smov 112  }
   0xf   :  { %v62_v4 = vsel %vm61_vm0, %v59_v2, 0.0  ;;  %v65_v5 = vsel %vm61_vm0, %v60_v3, 0.0  ;;  %s1149_s22 = smov 80   ;;  %s1150_s23 = smov 104  }
  0x10   :  { %63 = vadd.xlane.f32.xlu0 %v62_v4  ;;  %66 = vadd.xlane.f32.xlu1 %v65_v5  ;;  %s1151_s24 = smov 64   ;;  %s1152_s25 = smov 72  }
  0x11   :  { %130 = vmatpush.msra.mxu0 %v109_v11  ;;  %s1153_s26 = smov 56   ;;  %s1154_s27 = smov 40  }
  0x12   :  { %s1155_s28 = smov 48   ;;  %s1156_s29 = smov 16  }
  0x13   :  { %v1021_v7 = vpop.eup %1020  ;;  %131 = vmatpush.msra.mxu0 %v108_v12  ;;  %s1157_s30 = smov 24   ;;  %s1158_s15 = smov [#allocation7]  }
  0x14   :  { %v69_v8 = vmul.f32 32.0, %v1021_v7  ;;  %vm73_vm1 = vweird.f32 %v1021_v7  ;;  %s953_s18 = sshll.u32 %s1466_s7, 4  ;;  %s954_s18 = int_to_ptr.hbm [resolvable:$true] %s953_s18 }
  0x15   :  { %132 = vmatpush.msra.mxu0 %v107_v14 }
  0x16   :  { %v70_v9 = vsub.f32 1.0, %v69_v8 }
  0x18   :  { %v71_v13 = vmul.f32 %v1021_v7, %v70_v9 }
  0x1a   :  { %v72_v15 = vadd.f32 %v1021_v7, %v71_v13 }
  0x1c   :  { %v1230_v16 = vsel %vm73_vm1, %v1021_v7, %v72_v15 }
  0x83   :  { %v64_v17 = vpop.xlane.xlu0 %63  ;;  %v67_v18 = vpop.xlane.xlu1 %66 }
  0x84   :  { %v75_v19 = vmul.f32 %v1230_v16, %v64_v17  ;;  %v76_v20 = vmul.f32 %v1230_v16, %v67_v18 }
  0x86   :  { %v77_v21 = vadd.f32 1e-06, %v75_v19  ;;  %v78_v22 = vadd.f32 1e-06, %v76_v20 }
  0x88   :  { %1022 = vrsqrt.f32 %v77_v21  ;;  %vm95_vm3 = vweird.f32 %v78_v22  ;;  %vm85_vm5 = vweird.f32 %v77_v21 }
  0x89   :  { %1024 = vrsqrt.f32 %v78_v22 }
  0x8e   :  { %v1023_v23 = vpop.eup %1022 }
  0x8f   :  { %v1025_v24 = vpop.eup %1024  ;;  %v80_v25 = vmul.f32 %v1023_v23, %v77_v21  ;;  %vm86_vm2 = vweird.f32 %v1023_v23 }
  0x90   :  { %v90_v26 = vmul.f32 %v1025_v24, %v78_v22  ;;  %vm96_vm4 = vweird.f32 %v1025_v24  ;;  %vm87_vm6 = vmor %vm85_vm5, %vm86_vm2 }
  0x91   :  { %v81_v27 = vmul.f32 %v1023_v23, %v80_v25  ;;  %vm97_vm7 = vmor %vm95_vm3, %vm96_vm4 }
  0x92   :  { %v91_v28 = vmul.f32 %v1025_v24, %v90_v26 }
  0x93   :  { %v82_v29 = vmul.f32 0.5, %v81_v27 }
  0x94   :  { %v92_v30 = vmul.f32 0.5, %v91_v28 }
  0x95   :  { %v83_v31 = vsub.f32 1.5, %v82_v29 }
  0x96   :  { %v93_v32 = vsub.f32 1.5, %v92_v30 }
  0x97   :  { %v84_v33 = vmul.f32 %v1023_v23, %v83_v31 }
  0x98   :  { %v94_v34 = vmul.f32 %v1025_v24, %v93_v32 }
  0x99   :  { %v88_v36 = vsel %vm87_vm6, %v1023_v23, %v84_v33 }
  0x9a   :  { %v99_v37 = vmul.f32 %v88_v36, %v1208_v0  ;;  %v98_v38 = vsel %vm97_vm7, %v1025_v24, %v94_v34 }
  0x9b   :  { %v100_v40 = vmul.f32 %v98_v38, %v1210_v1 }
  0x9c   :  { %v105_v39 = vmul.f32 %v1018_v35, %v99_v37 }
  0x9d   :  { %v106_v41 = vmul.f32 %v1018_v35, %v100_v40 }
  0x9e   :  { %967 = vmatmul.msk.f32.vlgmr.msra.gmra.mxu0 %vm61_vm0, %v105_v39 }
  0xa6   :  { %968 = vmatmul.msk.f32.gmra.mxu0 %vm61_vm0, %v106_v41 }
 0x11b   :  { %v1238_v42 = vpop.f32.mrf.mxu0 }
 0x11c   :  { %141 = vrot.lane.b32.xlu0 %v1238_v42, %s1145_s2 }
 0x123   :  { %v1241_v43 = vpop.f32.mrf.mxu0 }
 0x124   :  { %325 = vrot.lane.b32.xlu0 %v1241_v43, %s1146_s19  ;;  %169 = vrot.lane.b32.xlu2 %v1241_v43, %s1145_s2 }
 0x12c   :  { %297 = vrot.lane.b32.xlu0 %v1238_v42, %s1146_s19  ;;  %323 = vrot.lane.b32.xlu2 %v1241_v43, %s1147_s20 }
 0x134   :  { %451 = vrot.lane.b32.xlu0 %v1238_v42, %s1148_s21  ;;  %453 = vrot.lane.b32.xlu2 %v1238_v42, %s1149_s22 }
 0x13c   :  { %481 = vrot.lane.b32.xlu0 %v1241_v43, %s1149_s22 }
 0x144   :  { %635 = vrot.lane.b32.xlu0 %v1241_v43, %s1150_s23 }
 0x17e   :  { %v170_v44 = vpop.permute.xlu2 %169 }
 0x17f   :  { %971 = vmatpush.xpose.msk.msra.mxu2 %vm143_vm8, %v170_v44 }
 0x182   :  { %972 = vmatmul.msk.f32.vlgmr.msra.gmra.mxu2 %vm143_vm8, %v1241_v43 }
 0x186   :  { %v324_v45 = vpop.permute.xlu2 %323 }
 0x18e   :  { %v142_v46 = vpop.permute.xlu0 %141  ;;  %v454_v48 = vpop.permute.xlu2 %453 }
 0x18f   :  { %969 = vmatpush.xpose.msk.msra.mxu1 %vm143_vm8, %v142_v46 }
 0x192   :  { %970 = vmatmul.msk.f32.vlgmr.msra.gmra.mxu1 %vm143_vm8, %v1238_v42 }
 0x196   :  { %v326_v47 = vpop.permute.xlu0 %325 }
 0x197   :  { %977 = vmatpush.xpose.msk.msrb.mxu2 %vm143_vm8, %v326_v47 }
 0x19a   :  { %978 = vmatmul.msk.f32.vlgmr.msrb.gmra.mxu2 %vm143_vm8, %v324_v45 }
 0x19b   :  { %981 = vmatpush.xpose.msk.msra.mxu2 %vm143_vm8, %v454_v48 }
 0x19e   :  { %v298_v49 = vpop.permute.xlu0 %297 }
 0x1a6   :  { %v452_v50 = vpop.permute.xlu0 %451 }
 0x1a7   :  { %982 = vmatmul.msk.f32.vlgmr.msra.gmra.mxu2 %vm143_vm8, %v452_v50 }
 0x1ae   :  { %v482_v57 = vpop.permute.xlu0 %481 }
 0x1af   :  { %983 = vmatpush.xpose.msk.msrb.mxu0 %vm143_vm8, %v482_v57 }
 0x1b6   :  { %v636_v22 = vpop.permute.xlu0 %635 }
 0x205   :  { %v1264_v53 = vpop.f32.mrf.mxu2 }
 0x206   :  { %v198_v5 = vsel %vm143_vm8, %v1264_v53, -inf }
 0x20f   :  { %v165_v51 = vpop.f32.mrf.mxu1 }
 0x210   :  { %v195_v52 = vsel %vm143_vm8, %v165_v51, -inf }
 0x211   :  { %196 = vmax.xlane.f32.xlu1 %v195_v52 }
 0x21d   :  { %v348_v54 = vpop.f32.mrf.mxu2 }
 0x21e   :  { %v354_v6 = vsel %vm143_vm8, %v348_v54, -inf }
 0x22a   :  { %243 = vrot.lane.b32.xlu1 %v1238_v42, %s1151_s24  ;;  %v1268_v55 = vpop.f32.mrf.mxu2 }
 0x22b   :  { %v507_v56 = vsel %vm143_vm8, %v1268_v55, -inf }
 0x22c   :  { %508 = vmax.xlane.f32.xlu0 %v507_v56 }
 0x232   :  { %295 = vrot.lane.b32.xlu1 %v1238_v42, %s1147_s20 }
 0x23a   :  { %607 = vrot.lane.b32.xlu1 %v1238_v42, %s1150_s23 }
 0x242   :  { %637 = vrot.lane.b32.xlu1 %v1241_v43, %s1152_s25 }
 0x284   :  { %v197_v58 = vpop.xlane.xlu1 %196 }
 0x285   :  { %v201_v59 = vsub.f32 %v165_v51, %v197_v58 }
 0x287   :  { %v203_v60 = vmul.f32 1.442695, %v201_v59 }
 0x289   :  { %1026 = vpow2.f32 %v203_v60 }
 0x28f   :  { %v1027_v61 = vpop.eup %1026 }
 0x290   :  { %v207_v62 = vsel %vm143_vm8, %v1027_v61, 0.0 }
 0x291   :  { %208 = vadd.xlane.f32.xlu2 %v207_v62 }
 0x29c   :  { %v244_v63 = vpop.permute.xlu1 %243 }
 0x29d   :  { %264 = vmatpush.msrb.mxu1 %v244_v63 }
 0x29f   :  { %975 = vmatpush.xpose.msk.msra.mxu1 %vm143_vm8, %v298_v49  ;;  %v509_v27 = vpop.xlane.xlu0 %508 }
 0x2a0   :  { %v513_v28 = vsub.f32 %v1268_v55, %v509_v27 }
 0x2a2   :  { %v515_v32 = vmul.f32 1.442695, %v513_v28 }
 0x2a4   :  { %v296_v2 = vpop.permute.xlu1 %295 }
 0x2a9   :  { %609 = vrot.lane.b32.xlu2 %v1238_v42, %s1152_s25 }
 0x2ac   :  { %v608_v3 = vpop.permute.xlu1 %607 }
 0x2b1   :  { %479 = vrot.lane.b32.xlu2 %v1241_v43, %s1148_s21 }
 0x2b4   :  { %v638_v4 = vpop.permute.xlu1 %637 }
 0x2b5   :  { %989 = vmatpush.xpose.msk.msra.mxu0 %vm143_vm8, %v638_v4 }
 0x2da   :  { %199 = vmax.xlane.f32.xlu2 %v198_v5 }
 0x2e2   :  { %355 = vmax.xlane.f32.xlu2 %v354_v6 }
 0x304   :  { %v209_v7 = vpop.xlane.xlu2 %208 }
 0x305   :  { %1028 = vrcp.f32 %v209_v7  ;;  %v224_v12 = vand.u32 2147483648, %v209_v7  ;;  %v222_v14 = vand.u32 2147483647, %v209_v7  ;;  %vm218_vm10 = vweird.f32 %v209_v7 }
 0x307   :  { %v225_v17 = vor.u32 1.1754944e-38, %v224_v12  ;;  %vm223_vm12 = vcmp.eq.f32.partialorder %v222_v14, 8.507059e+37 }
 0x30b   :  { %v1029_v8 = vpop.eup %1028 }
 0x30c   :  { %v214_v9 = vmul.f32 %v1029_v8, %v209_v7  ;;  %v610_v10 = vpop.permute.xlu2 %609  ;;  %vm219_vm9 = vweird.f32 %v1029_v8 }
 0x30d   :  { %987 = vmatpush.xpose.msk.msrb.mxu2 %vm143_vm8, %v610_v10  ;;  %vm220_vm11 = vmor %vm218_vm10, %vm219_vm9 }
 0x30e   :  { %v215_v11 = vsub.f32 1.0, %v214_v9 }
 0x310   :  { %v216_v13 = vmul.f32 %v1029_v8, %v215_v11  ;;  %988 = vmatmul.msk.f32.vlgmr.msrb.gmra.mxu2 %vm143_vm8, %v608_v3 }
 0x312   :  { %v217_v15 = vadd.f32 %v1029_v8, %v216_v13 }
 0x314   :  { %v480_v18 = vpop.permute.xlu2 %479  ;;  %v221_v19 = vsel %vm220_vm11, %v1029_v8, %v217_v15 }
 0x315   :  { %984 = vmatmul.msk.f32.vlgmr.msrb.gmra.mxu0 %vm143_vm8, %v480_v18  ;;  %v226_v20 = vsel %vm223_vm12, %v225_v17, %v221_v19 }
 0x316   :  { %v227_v21 = vmul.f32 %v1027_v61, %v226_v20 }
 0x318   :  { %973 = vmatmul.msk.f32.vlgmr.msrb.gmra.mxu1 %vm143_vm8, %v227_v21 }
 0x31d   :  { %990 = vmatmul.msk.f32.vlgmr.msra.gmra.mxu0 %vm143_vm8, %v636_v22 }
 0x320   :  { %976 = vmatmul.msk.f32.vlgmr.msra.gmra.mxu1 %vm143_vm8, %v296_v2 }
 0x34d   :  { %v200_v23 = vpop.xlane.xlu2 %199 }
 0x34e   :  { %v202_v37 = vsub.f32 %v1264_v53, %v200_v23 }
 0x350   :  { %v205_v41 = vmul.f32 1.442695, %v202_v37 }
 0x355   :  { %v356_v24 = vpop.xlane.xlu2 %355 }
 0x356   :  { %v358_v25 = vsub.f32 %v348_v54, %v356_v24 }
 0x358   :  { %v361_v26 = vmul.f32 1.442695, %v358_v25 }
 0x35a   :  { %1030 = vpow2.f32 %v361_v26 }
 0x35b   :  { %1032 = vpow2.f32 %v515_v32 }
 0x35c   :  { %1034 = vpow2.f32 %v205_v41 }
 0x360   :  { %v1296_v33 = vpop.eup %1030 }
 0x361   :  { %v366_v36 = vsel %vm143_vm8, %v1296_v33, 0.0  ;;  %v1303_v40 = vpop.eup %1032 }
 0x362   :  { %v519_v45 = vsel %vm143_vm8, %v1303_v40, 0.0  ;;  %v1308_v47 = vpop.eup %1034 }
 0x363   :  { %v210_v48 = vsel %vm143_vm8, %v1308_v47, 0.0 }
 0x392   :  { %v504_v29 = vpop.f32.mrf.mxu0 }
 0x393   :  { %v510_v30 = vsel %vm143_vm8, %v504_v29, -inf  ;;  %v632_v44 = vpop.f32.mrf.mxu2 }
 0x394   :  { %511 = vmax.xlane.f32.xlu0 %v510_v30  ;;  %v663_v46 = vsel %vm143_vm8, %v632_v44, -inf }
 0x395   :  { %v1294_v31 = vpop.f32.mrf.mxu1 }
 0x39a   :  { %v660_v34 = vpop.f32.mrf.mxu0 }
 0x39b   :  { %v666_v35 = vsel %vm143_vm8, %v660_v34, -inf }
 0x39c   :  { %667 = vmax.xlane.f32.xlu2 %v666_v35  ;;  %367 = vadd.xlane.f32.xlu0 %v366_v36 }
 0x39d   :  { %v320_v38 = vpop.f32.mrf.mxu1 }
 0x39e   :  { %v351_v39 = vsel %vm143_vm8, %v320_v38, -inf }
 0x39f   :  { %352 = vmax.xlane.f32.xlu1 %v351_v39 }
 0x3a4   :  { %520 = vadd.xlane.f32.xlu2 %v519_v45 }
 0x3a7   :  { %664 = vmax.xlane.f32.xlu1 %v663_v46 }
 0x3af   :  { %211 = vadd.xlane.f32.xlu1 %v210_v48 }
 0x3b0   :  { %399 = vrot.lane.b32.xlu0 %v1238_v42, %s1153_s26 }
 0x3b8   :  { %425 = vrot.lane.b32.xlu0 %v1241_v43, %s1153_s26 }
 0x3c8   :  { %269 = vrot.lane.b32.xlu1 %v1241_v43, %s1151_s24 }
 0x407   :  { %v512_v49 = vpop.xlane.xlu0 %511 }
 0x408   :  { %v514_v4 = vsub.f32 %v504_v29, %v512_v49 }
 0x40a   :  { %v517_v8 = vmul.f32 1.442695, %v514_v4 }
 0x40f   :  { %v368_v50 = vpop.xlane.xlu0 %367  ;;  %v668_v51 = vpop.xlane.xlu2 %667 }
 0x410   :  { %1036 = vrcp.f32 %v368_v50  ;;  %v670_v52 = vsub.f32 %v660_v34, %v668_v51  ;;  %v395_v9 = vand.u32 2147483648, %v368_v50  ;;  %vm389_vm14 = vweird.f32 %v368_v50 }
 0x411   :  { %v393_v10 = vand.u32 2147483647, %v368_v50 }
 0x412   :  { %v353_v53 = vpop.xlane.xlu1 %352  ;;  %v673_v54 = vmul.f32 1.442695, %v670_v52  ;;  %v396_v15 = vor.u32 1.1754944e-38, %v395_v9 }
 0x413   :  { %v357_v55 = vsub.f32 %v320_v38, %v353_v53  ;;  %vm394_vm1 = vcmp.eq.f32.partialorder %v393_v10, 8.507059e+37 }
 0x414   :  { %1038 = vpow2.f32 %v673_v54 }
 0x415   :  { %v359_v56 = vmul.f32 1.442695, %v357_v55 }
 0x416   :  { %v1037_v57 = vpop.eup %1036 }
 0x417   :  { %v385_v58 = vmul.f32 %v1037_v57, %v368_v50  ;;  %1040 = vpow2.f32 %v359_v56  ;;  %vm390_vm13 = vweird.f32 %v1037_v57  ;;  %v521_v36 = vpop.xlane.xlu2 %520 }
 0x418   :  { %vm391_vm15 = vmor %vm389_vm14, %vm390_vm13  ;;  %vm530_vm12 = vweird.f32 %v521_v36 }
 0x419   :  { %v386_v59 = vsub.f32 1.0, %v385_v58 }
 0x41a   :  { %v665_v60 = vpop.xlane.xlu1 %664  ;;  %v1316_v61 = vpop.eup %1038 }
 0x41b   :  { %v669_v62 = vsub.f32 %v632_v44, %v665_v60  ;;  %v387_v63 = vmul.f32 %v1037_v57, %v386_v59  ;;  %v678_v2 = vsel %vm143_vm8, %v1316_v61, 0.0  ;;  %v536_v59 = vand.u32 2147483648, %v521_v36 }
 0x41c   :  { %679 = vadd.xlane.f32.xlu1 %v678_v2 }
 0x41d   :  { %v1320_v3 = vpop.eup %1040  ;;  %v671_v5 = vmul.f32 1.442695, %v669_v62  ;;  %v388_v7 = vadd.f32 %v1037_v57, %v387_v63  ;;  %v534_v63 = vand.u32 2147483647, %v521_v36 }
 0x41e   :  { %v363_v6 = vsel %vm143_vm8, %v1320_v3, 0.0 }
 0x41f   :  { %1042 = vpow2.f32 %v671_v5  ;;  %364 = vadd.xlane.f32.xlu0 %v363_v6  ;;  %v392_v13 = vsel %vm391_vm15, %v1037_v57, %v388_v7  ;;  %v537_v7 = vor.u32 1.1754944e-38, %v536_v59  ;;  %vm535_vm14 = vcmp.eq.f32.partialorder %v534_v63, 8.507059e+37 }
 0x420   :  { %v397_v18 = vsel %vm394_vm1, %v396_v15, %v392_v13 }
 0x421   :  { %v398_v22 = vmul.f32 %v1296_v33, %v397_v18 }
 0x422   :  { %v212_v11 = vpop.xlane.xlu1 %211  ;;  %v400_v12 = vpop.permute.xlu0 %399 }
 0x423   :  { %1044 = vrcp.f32 %v212_v11  ;;  %v239_v28 = vand.u32 2147483648, %v212_v11  ;;  %vm233_vm3 = vweird.f32 %v212_v11  ;;  %v237_v29 = vand.u32 2147483647, %v212_v11 }
 0x424   :  { %1046 = vpow2.f32 %v517_v8 }
 0x425   :  { %v1324_v14 = vpop.eup %1042  ;;  %v240_v32 = vor.u32 1.1754944e-38, %v239_v28  ;;  %vm238_vm5 = vcmp.eq.f32.partialorder %v237_v29, 8.507059e+37  ;;  %1048 = vrcp.f32 %v521_v36 }
 0x426   :  { %v675_v17 = vsel %vm143_vm8, %v1324_v14, 0.0 }
 0x427   :  { %676 = vadd.xlane.f32.xlu2 %v675_v17 }
 0x429   :  { %v1045_v19 = vpop.eup %1044 }
 0x42a   :  { %v229_v20 = vmul.f32 %v1045_v19, %v212_v11  ;;  %v426_v21 = vpop.permute.xlu0 %425  ;;  %v1329_v23 = vpop.eup %1046  ;;  %vm234_vm2 = vweird.f32 %v1045_v19 }
 0x42b   :  { %446 = vmatpush.msrb.mxu1 %v426_v21  ;;  %v522_v26 = vsel %vm143_vm8, %v1329_v23, 0.0  ;;  %vm235_vm4 = vmor %vm233_vm3, %vm234_vm2  ;;  %v1049_v38 = vpop.eup %1048 }
 0x42c   :  { %v230_v24 = vsub.f32 1.0, %v229_v20  ;;  %980 = vmatmul.msk.f32.vlgmr.msrb.gmra.mxu1 %vm143_vm8, %v398_v22  ;;  %v526_v39 = vmul.f32 %v1049_v38, %v521_v36  ;;  %vm531_vm10 = vweird.f32 %v1049_v38 }
 0x42d   :  { %vm532_vm13 = vmor %vm530_vm12, %vm531_vm10 }
 0x42e   :  { %v231_v25 = vmul.f32 %v1045_v19, %v230_v24 }
 0x42f   :  { %523 = vadd.xlane.f32.xlu2 %v522_v26 }
 0x430   :  { %v232_v27 = vadd.f32 %v1045_v19, %v231_v25 }
 0x432   :  { %v236_v30 = vsel %vm235_vm4, %v1045_v19, %v232_v27 }
 0x433   :  { %711 = vrot.lane.b32.xlu0 %v1238_v42, %s1154_s27  ;;  %v241_v33 = vsel %vm238_vm5, %v240_v32, %v236_v30 }
 0x434   :  { %v242_v35 = vmul.f32 %v1308_v47, %v241_v33  ;;  %v527_v47 = vsub.f32 1.0, %v526_v39 }
 0x436   :  { %v528_v49 = vmul.f32 %v1049_v38, %v527_v47 }
 0x438   :  { %v529_v58 = vadd.f32 %v1049_v38, %v528_v49  ;;  %v797_v49 = vld [vmem:[%s1462_s3 + $0x10] sm:$0xff] }
 0x43a   :  { %v270_v34 = vpop.permute.xlu1 %269  ;;  %v533_v5 = vsel %vm532_vm13, %v1049_v38, %v529_v58  ;;  %vm789_vm13 = vcmask 130048  }
 0x43b   :  { %290 = vmatpush.msra.mxu3 %v270_v34  ;;  %737 = vrot.lane.b32.xlu0 %v1241_v43, %s1154_s27  ;;  %v538_v10 = vsel %vm535_vm14, %v537_v7, %v533_v5  ;;  %vm792_vm14 = vcmask 195584  }
 0x43c   :  { %974 = vmatmul.msk.f32.vlgmr.msra.gmra.mxu3 %vm143_vm8, %v242_v35  ;;  %v539_v20 = vmul.f32 %v1303_v40, %v538_v10 }
 0x43d   :  { %420 = vmatpush.msrb.mxu3 %v400_v12 }
 0x447   :  { %555 = vrot.lane.b32.xlu2 %v1238_v42, %s1155_s28 }
 0x44f   :  { %581 = vrot.lane.b32.xlu2 %v1241_v43, %s1155_s28 }
 0x48f   :  { %v1340_v44 = vpop.xlane.xlu1 %679 }
 0x490   :  { %v707_v33 = vand.u32 2147483648, %v1340_v44  ;;  %vm701_vm10 = vweird.f32 %v1340_v44  ;;  %v705_v36 = vand.u32 2147483647, %v1340_v44 }
 0x492   :  { %v365_v37 = vpop.xlane.xlu0 %364  ;;  %vm706_vm12 = vcmp.eq.f32.partialorder %v705_v36, 8.507059e+37 }
 0x493   :  { %1050 = vrcp.f32 %v365_v37  ;;  %v380_v43 = vand.u32 2147483648, %v365_v37  ;;  %v378_v50 = vand.u32 2147483647, %v365_v37  ;;  %vm374_vm7 = vweird.f32 %v365_v37 }
 0x495   :  { %v381_v53 = vor.u32 1.1754944e-38, %v380_v43  ;;  %vm379_vm11 = vcmp.eq.f32.partialorder %v378_v50, 8.507059e+37  ;;  %v796_v50 = vld [vmem:[%s1462_s3 + $0x8] sm:$0xff] }
 0x499   :  { %v1051_v41 = vpop.eup %1050 }
 0x49a   :  { %v370_v45 = vmul.f32 %v1051_v41, %v365_v37  ;;  %v1342_v46 = vpop.xlane.xlu2 %676  ;;  %vm375_vm6 = vweird.f32 %v1051_v41 }
 0x49b   :  { %1052 = vrcp.f32 %v1342_v46  ;;  %vm376_vm9 = vmor %vm374_vm7, %vm375_vm6  ;;  %vm686_vm1 = vweird.f32 %v1342_v46  ;;  %v690_v18 = vand.u32 2147483647, %v1342_v46 }
 0x49c   :  { %v371_v48 = vsub.f32 1.0, %v370_v45  ;;  %1054 = vrcp.f32 %v1340_v44 }
 0x49d   :  { %vm691_vm6 = vcmp.eq.f32.partialorder %v690_v18, 8.507059e+37  ;;  %v911_v18 = vld [vmem:[%s1465_s6 + $0x30] sm:$0xff] }
 0x49e   :  { %v372_v42 = vmul.f32 %v1051_v41, %v371_v48 }
 0x4a0   :  { %v373_v51 = vadd.f32 %v1051_v41, %v372_v42 }
 0x4a1   :  { %v1053_v52 = vpop.eup %1052 }
 0x4a2   :  { %v682_v54 = vmul.f32 %v1053_v52, %v1342_v46  ;;  %v524_v55 = vpop.xlane.xlu2 %523  ;;  %v377_v56 = vsel %vm376_vm9, %v1051_v41, %v373_v51  ;;  %v1347_v57 = vpop.eup %1054  ;;  %vm687_vm15 = vweird.f32 %v1053_v52  ;;  %v708_v41 = vor.u32 1.1754944e-38, %v707_v33  ;;  %v795_v51 = vld [vmem:[%s1462_s3] sm:$0xff] }
 0x4a3   :  { %1056 = vrcp.f32 %v524_v55  ;;  %v382_v62 = vsel %vm379_vm11, %v381_v53, %v377_v56  ;;  %v697_v4 = vmul.f32 %v1347_v57, %v1340_v44  ;;  %v551_v19 = vand.u32 2147483648, %v524_v55  ;;  %vm688_vm2 = vmor %vm686_vm1, %vm687_vm15  ;;  %v1019_v33 = vld [vmem:[%s1463_s4] ss:$0 sm:$0xff] }
 0x4a4   :  { %v683_v60 = vsub.f32 1.0, %v682_v54  ;;  %v383_v2 = vmul.f32 %v1320_v3, %v382_v62  ;;  %v692_v3 = vand.u32 2147483648, %v1342_v46  ;;  %v549_v24 = vand.u32 2147483647, %v524_v55 }
 0x4a5   :  { %v712_v9 = vpop.permute.xlu0 %711  ;;  %v698_v11 = vsub.f32 1.0, %v697_v4  ;;  %vm545_vm4 = vweird.f32 %v524_v55  ;;  %vm702_vm5 = vweird.f32 %v1347_v57  ;;  %v552_v28 = vor.u32 1.1754944e-38, %v551_v19  ;;  %v910_v19 = vld [vmem:[%s1465_s6 + $0x28] sm:$0xff] }
 0x4a6   :  { %v684_v6 = vmul.f32 %v1053_v52, %v683_v60  ;;  %979 = vmatmul.msk.f32.vlgmr.msrb.gmra.mxu3 %vm143_vm8, %v383_v2  ;;  %v693_v26 = vor.u32 1.1754944e-38, %v692_v3  ;;  %vm550_vm9 = vcmp.eq.f32.partialorder %v549_v24, 8.507059e+37  ;;  %vm703_vm11 = vmor %vm701_vm10, %vm702_vm5  ;;  %v908_v24 = vld [vmem:[%s1465_s6 + $0x18] sm:$0xff]  ;;  %vm913_vm5 = vcmask 523264  }
 0x4a7   :  { %v699_v21 = vmul.f32 %v1347_v57, %v698_v11  ;;  %v872_v11 = vld [vmem:[%s1464_s5 + $0x10] sm:$0xff] }
 0x4a8   :  { %v685_v15 = vadd.f32 %v1053_v52, %v684_v6 }
 0x4a9   :  { %v1057_v8 = vpop.eup %1056  ;;  %v700_v29 = vadd.f32 %v1347_v57, %v699_v21  ;;  %v448_v47 = vpop.f32.mrf.mxu1 }
 0x4aa   :  { %v541_v12 = vmul.f32 %v1057_v8, %v524_v55  ;;  %v556_v13 = vpop.permute.xlu2 %555  ;;  %vm546_vm3 = vweird.f32 %v1057_v8  ;;  %v689_v25 = vsel %vm688_vm2, %v1053_v52, %v685_v15 }
 0x4ab   :  { %576 = vmatpush.msra.mxu3 %v556_v13  ;;  %vm547_vm7 = vmor %vm545_vm4, %vm546_vm3  ;;  %v694_v40 = vsel %vm691_vm6, %v693_v26, %v689_v25  ;;  %v704_v39 = vsel %vm703_vm11, %v1347_v57, %v700_v29 }
 0x4ac   :  { %v542_v17 = vsub.f32 1.0, %v541_v12  ;;  %v695_v38 = vmul.f32 %v1324_v14, %v694_v40  ;;  %v709_v45 = vsel %vm706_vm12, %v708_v41, %v704_v39  ;;  %v870_v12 = vld [vmem:[%s1464_s5] sm:$0xff] }
 0x4ad   :  { %732 = vmatpush.msrb.mxu3 %v712_v9  ;;  %v738_v35 = vpop.permute.xlu0 %737  ;;  %v710_v46 = vmul.f32 %v1316_v61, %v709_v45  ;;  %v798_v61 = vld [vmem:[%s1462_s3 + $0x18] sm:$0xff]  ;;  %s951_s3 = sshll.u32 %s1158_s15, 4  ;;  %s952_s3 = int_to_ptr.vmem [resolvable:$true] %s951_s3 }
 0x4ae   :  { %v543_v22 = vmul.f32 %v1057_v8, %v542_v17  ;;  %985 = vmatmul.msk.f32.vlgmr.msra.gmra.mxu3 %vm143_vm8, %v539_v20  ;;  %817 = vmatpush.msra.mxu2 %v798_v61  ;;  %v912_v17 = vld [vmem:[%s1465_s6 + $0x38] sm:$0xff]  ;;  %v909_v20 = vld [vmem:[%s1465_s6 + $0x20] sm:$0xff] }
 0x4af   :  { %928 = vmatpush.msra.mxu3 %v912_v17 }
 0x4b0   :  { %v544_v27 = vadd.f32 %v1057_v8, %v543_v22  ;;  %818 = vmatpush.msra.mxu2 %v797_v49 }
 0x4b1   :  { %929 = vmatpush.msra.mxu3 %v911_v18 }
 0x4b2   :  { %v548_v30 = vsel %vm547_vm7, %v1057_v8, %v544_v27  ;;  %v582_v32 = vpop.permute.xlu2 %581  ;;  %819 = vmatpush.msra.mxu2 %v796_v50 }
 0x4b3   :  { %v553_v34 = vsel %vm550_vm9, %v552_v28, %v548_v30  ;;  %602 = vmatpush.msra.mxu1 %v582_v32  ;;  %930 = vmatpush.msra.mxu3 %v910_v19  ;;  %v907_v28 = vld [vmem:[%s1465_s6 + $0x10] sm:$0xff] }
 0x4b4   :  { %v554_v37 = vmul.f32 %v1329_v23, %v553_v34  ;;  %820 = vmatpush.msra.mxu2 %v795_v51 }
 0x4b5   :  { %758 = vmatpush.msrb.mxu1 %v738_v35  ;;  %931 = vmatpush.msra.mxu3 %v909_v20 }
 0x4b6   :  { %986 = vmatmul.msk.f32.vlgmr.msra.gmra.mxu1 %vm143_vm8, %v554_v37  ;;  %991 = vmatmul.msk.f32.vlgmr.msrb.gmra.mxu3 %vm143_vm8, %v695_v38 }
 0x4b7   :  { %932 = vmatpush.msra.mxu3 %v908_v24 }
 0x4b9   :  { %933 = vmatpush.msra.mxu3 %v907_v28 }
 0x4be   :  { %992 = vmatmul.msk.f32.vlgmr.msrb.gmra.mxu1 %vm143_vm8, %v710_v46 }
 0x4bf   :  { %v292_v44 = vpop.f32.mrf.mxu3 }
 0x529   :  { %v422_v23 = vpop.f32.mrf.mxu3 }
 0x52a   :  { %765 = vrot.lane.b32.xlu2 %v422_v23, %s1142_s10 }
 0x531   :  { %v578_v48 = vpop.f32.mrf.mxu3 }
 0x532   :  { %773 = vrot.lane.b32.xlu0 %v578_v48, %s1156_s29  ;;  %v905_v48 = vld [vmem:[%s1465_s6] sm:$0xff] }
 0x533   :  { %v604_v14 = vpop.f32.mrf.mxu1 }
 0x534   :  { %775 = vrot.lane.b32.xlu1 %v604_v14, %s1156_s29 }
 0x539   :  { %v734_v42 = vpop.f32.mrf.mxu3 }
 0x53a   :  { %767 = vrot.lane.b32.xlu0 %v448_v47, %s1142_s10  ;;  %781 = vrot.lane.b32.xlu2 %v734_v42, %s1157_s30  ;;  %v906_v47 = vld [vmem:[%s1465_s6 + $0x8] sm:$0xff] }
 0x53b   :  { %v760_v43 = vpop.f32.mrf.mxu1  ;;  %934 = vmatpush.msra.mxu3 %v906_v47 }
 0x53d   :  { %935 = vmatpush.msra.mxu3 %v905_v48 }
 0x542   :  { %783 = vrot.lane.b32.xlu2 %v760_v43, %s1157_s30 }
 0x584   :  { %v766_v52 = vpop.permute.xlu2 %765 }
 0x585   :  { %v787_v53 = vsel %vm143_vm8, %v1294_v31, %v766_v52 }
 0x594   :  { %v782_v54 = vpop.permute.xlu2 %781 }
 0x59c   :  { %v784_v62 = vpop.permute.xlu2 %783 }
 0x5a4   :  { %v774_v55 = vpop.permute.xlu0 %773 }
 0x5a5   :  { %v790_v56 = vsel %vm789_vm13, %v787_v53, %v774_v55 }
 0x5a6   :  { %v793_v57 = vsel %vm792_vm14, %v790_v56, %v782_v54  ;;  %v776_v59 = vpop.permute.xlu1 %775 }
 0x5a7   :  { %993 = vmatmul.msk.f32.vlgmr.msra.gmra.mxu2 %vm61_vm0, %v793_v57 }
 0x5ac   :  { %v768_v58 = vpop.permute.xlu0 %767 }
 0x5ad   :  { %v788_v60 = vsel %vm143_vm8, %v292_v44, %v768_v58 }
 0x5ae   :  { %v791_v63 = vsel %vm789_vm13, %v788_v60, %v776_v59 }
 0x5af   :  { %v794_v2 = vsel %vm792_vm14, %v791_v63, %v784_v62 }
 0x5b0   :  { %994 = vmatmul.msk.f32.gmra.mxu2 %vm61_vm0, %v794_v2 }
 0x62a   :  { %v822_v4 = vpop.f32.mrf.mxu2 }
 0x62b   :  { %v1393_v5 = vadd.f32 %v822_v4, %v1208_v0  ;;  %v873_v0 = vld [vmem:[%s1464_s5 + $0x18] sm:$0xff] }
 0x62c   :  { %892 = vmatpush.msrb.mxu0 %v873_v0 }
 0x62d   :  { %v830_v31 = vmul.f32 %v1393_v5, %v1393_v5 }
 0x62e   :  { %893 = vmatpush.msrb.mxu0 %v872_v11 }
 0x62f   :  { %v832_v6 = vsel %vm61_vm0, %v830_v31, 0.0 }
 0x630   :  { %833 = vadd.xlane.f32.xlu0 %v832_v6 }
 0x633   :  { %v825_v7 = vpop.f32.mrf.mxu2 }
 0x634   :  { %v1399_v8 = vadd.f32 %v825_v7, %v1210_v1  ;;  %v871_v1 = vld [vmem:[%s1464_s5 + $0x8] sm:$0xff] }
 0x635   :  { %894 = vmatpush.msrb.mxu0 %v871_v1 }
 0x636   :  { %v831_v9 = vmul.f32 %v1399_v8, %v1399_v8 }
 0x637   :  { %895 = vmatpush.msrb.mxu0 %v870_v12 }
 0x638   :  { %v835_v10 = vsel %vm61_vm0, %v831_v9, 0.0 }
 0x639   :  { %836 = vadd.xlane.f32.xlu2 %v835_v10 }
 0x6a3   :  { %v834_v13 = vpop.xlane.xlu0 %833 }
 0x6a4   :  { %v838_v15 = vmul.f32 %v834_v13, %v1230_v16 }
 0x6a6   :  { %v840_v3 = vadd.f32 1e-06, %v838_v15 }
 0x6a8   :  { %1058 = vrsqrt.f32 %v840_v3  ;;  %vm848_vm15 = vweird.f32 %v840_v3 }
 0x6ac   :  { %v837_v21 = vpop.xlane.xlu2 %836 }
 0x6ad   :  { %v839_v22 = vmul.f32 %v837_v21, %v1230_v16 }
 0x6ae   :  { %v1059_v25 = vpop.eup %1058 }
 0x6af   :  { %v843_v26 = vmul.f32 %v1059_v25, %v840_v3  ;;  %v841_v27 = vadd.f32 1e-06, %v839_v22  ;;  %vm849_vm8 = vweird.f32 %v1059_v25 }
 0x6b0   :  { %vm850_vm1 = vmor %vm848_vm15, %vm849_vm8 }
 0x6b1   :  { %v844_v29 = vmul.f32 %v1059_v25, %v843_v26  ;;  %1060 = vrsqrt.f32 %v841_v27  ;;  %vm858_vm3 = vweird.f32 %v841_v27 }
 0x6b3   :  { %v845_v40 = vmul.f32 0.5, %v844_v29 }
 0x6b5   :  { %v846_v30 = vsub.f32 1.5, %v845_v40 }
 0x6b7   :  { %v1061_v16 = vpop.eup %1060  ;;  %v847_v32 = vmul.f32 %v1059_v25, %v846_v30 }
 0x6b8   :  { %v853_v34 = vmul.f32 %v1061_v16, %v841_v27  ;;  %vm859_vm2 = vweird.f32 %v1061_v16 }
 0x6b9   :  { %v851_v35 = vsel %vm850_vm1, %v1059_v25, %v847_v32  ;;  %vm860_vm4 = vmor %vm858_vm3, %vm859_vm2 }
 0x6ba   :  { %v862_v36 = vmul.f32 %v851_v35, %v1393_v5  ;;  %v854_v37 = vmul.f32 %v1061_v16, %v853_v34 }
 0x6bc   :  { %v868_v38 = vmul.f32 %v1019_v33, %v862_v36  ;;  %v855_v39 = vmul.f32 0.5, %v854_v37 }
 0x6be   :  { %v856_v41 = vsub.f32 1.5, %v855_v39  ;;  %995 = vmatmul.msk.f32.vlgmr.msrb.gmra.mxu0 %vm61_vm0, %v868_v38 }
 0x6c0   :  { %v857_v45 = vmul.f32 %v1061_v16, %v856_v41 }
 0x6c2   :  { %v861_v46 = vsel %vm860_vm4, %v1061_v16, %v857_v45 }
 0x6c3   :  { %v863_v44 = vmul.f32 %v861_v46, %v1399_v8 }
 0x6c5   :  { %v869_v23 = vmul.f32 %v1019_v33, %v863_v44 }
 0x6c7   :  { %996 = vmatmul.msk.f32.gmra.mxu0 %vm61_vm0, %v869_v23 }
 0x73b   :  { %v897_v14 = vpop.f32.mrf.mxu0 }
 0x73c   :  { %v903_v42 = vmax.f32 %v897_v14, 0.0 }
 0x73e   :  { %997 = vmatmul.msk.f32.vlgmr.msra.gmra.mxu3 %vm913_vm5, %v903_v42 }
 0x744   :  { %v900_v43 = vpop.f32.mrf.mxu0 }
 0x745   :  { %v904_v61 = vmax.f32 %v900_v43, 0.0 }
 0x747   :  { %998 = vmatmul.msk.f32.gmra.mxu3 %vm913_vm5, %v904_v61 }
 0x7c1   :  { %v937_v49 = vpop.f32.mrf.mxu3 }
 0x7c2   :  { %v943_v50 = vadd.f32 %v937_v49, %v1393_v5 }
 0x7c4   :  { %945 = vst.msk [vmem:[#allocation7] sm:$0xff] %vm61_vm0, %v943_v50 }
 0x7ca   :  { %v940_v51 = vpop.f32.mrf.mxu3 }
 0x7cb   :  { %v944_v52 = vadd.f32 %v940_v51, %v1399_v8 }
 0x7cd   :  { %946 = vst.msk [vmem:[#allocation7 + $0x8] sm:$0xff] %vm61_vm0, %v944_v52 }
 0x7ce   :  { %959 = dma.vmem_to_hbm [thread:$0]  %s952_s3, 256, %s954_s18, [#allocation4], %s1141_s9, %s1141_s9, %s1142_s10  }
 0x7cf   :  { %1138 = dma.done.wait [#allocation4], 256  }
 0x7d0   :  { %1139 = vsyncadd [#allocation4], 4294967040 }
 0x7d1   :  { %964 = vsyncpa [#allocation3], 1 }
 0x7d2   :  { %965 = vsyncpa [#allocation6], 1 }
 0x7d3   :  { %966 = vsyncpa [#allocation4], 1 }

</bundles_post_ra>
